<compile_context>
chip_gen: v5e
topology: v5e:2x2
jax: 0.10.0
libtpu: 0.0.40
codegen_flags: <defaults>
</compile_context>

<pallas_src>
import functools

import jax
import jax.numpy as jnp
from jax import lax
from jax.experimental import pallas as pl
from jax.experimental.pallas import tpu as pltpu


def _syndrome_loss_kernel(x_ref, h_ref, out_ref, acc_ref, *, tile_n, x_resident):
    n = pl.program_id(1)
    last_n = pl.num_programs(1) - 1

    @pl.when(n == 0)
    def _():
        acc_ref[...] = jnp.zeros_like(acc_ref)

    # Hard decision: sigmoid(x) > 0.5  <=>  x > 0 (sign test, dtype-agnostic,
    # no EUP transcendental). x is either resident (slice the current N chunk)
    # or already the per-step tile.
    if x_resident:
        start = pl.multiple_of(n * tile_n, 128)
        x_blk = x_ref[:, pl.ds(start, tile_n)]
    else:
        x_blk = x_ref[...]
    hard = (x_blk > 0).astype(jnp.bfloat16)                  # [B, tn], 0/1 exact

    # Lane-dense accumulation: acc[B, tm] += hard[B, tn] . H[tm, tn]^T
    # (contract dim 1 of both operands; bf16 operands, f32 accumulation).
    acc_ref[...] += lax.dot_general(
        hard, h_ref[...],
        dimension_numbers=(((1,), (1,)), ((), ())),
        preferred_element_type=jnp.float32,
    )

    @pl.when(n == last_n)
    def _():
        # Integer parity of the per-check popcount (counts <= N < 2^24 so the
        # f32 accumulator is exact). One partial sum per M tile -> output block.
        parity = (acc_ref[...].astype(jnp.int32) & 1).astype(jnp.float32)
        partial = jnp.sum(parity)
        out_ref[...] = jnp.broadcast_to(partial, out_ref.shape)


def _round_up(x: int, m: int) -> int:
    return (x + m - 1) // m * m


def _largest_divisor_tile(dim: int, preferred: int, align: int) -> int:
    """Largest multiple of `align` that divides `dim` (dim is a multiple of
    `align`) and is <= max(preferred, align)."""
    if dim <= preferred:
        return dim
    t = max((preferred // align) * align, align)
    while t > align and dim % t != 0:
        t -= align
    return t


def syndrome_loss(soft_codeword, H_matrix=None, *,
                  tile_m: int = 1024, tile_n: int = 4096,
                  vmem_budget_bytes: int = 40 * 1024 * 1024):
    """Pallas implementation of SyndromeLoss.forward.

    loss = mean( ((sigmoid(x) > 0.5) @ H.T) mod 2 )
    """
    if H_matrix is None:
        return jnp.array(0.0, dtype=jnp.float32)

    B, N = soft_codeword.shape
    M, N2 = H_matrix.shape
    assert N == N2, "soft_codeword and H_matrix code-length mismatch"
    # f32 accumulation of 0/1 counts is exact only up to 2^24 per check.
    assert N < (1 << 24), "code length too large for exact f32 popcount"

    Mpad, Npad = _round_up(M, 128), _round_up(N, 128)

    x = soft_codeword                      # keep native dtype (no f32 upcast)
    h = H_matrix.astype(jnp.bfloat16)      # entries are 0/1 -> lossless in bf16

    # Zero-padding is exact: padded x entries give hard bit 0, padded H
    # rows/cols are all-zero, so they contribute 0 to every parity count.
    if Npad != N:
        x = jnp.pad(x, ((0, 0), (0, Npad - N)))
        h = jnp.pad(h, ((0, 0), (0, Npad - N)))
    if Mpad != M:
        h = jnp.pad(h, ((0, Mpad - M), (0, 0)))

    # VMEM budget (v7x-safe default ~40 MiB of tile data):
    #   x resident (pessimistically double-buffered) + 2 x H tile + acc + slack.
    x_itemsize = jnp.dtype(x.dtype).itemsize
    x_resident_bytes = 2 * B * Npad * x_itemsize
    x_resident = x_resident_bytes <= vmem_budget_bytes // 4

    slack = 2 * 1024 * 1024  # accumulator, output blocks, Mosaic internals
    h_budget = vmem_budget_bytes - (x_resident_bytes if x_resident else 0) - slack
    h_budget = max(h_budget, 2 * 128 * 128 * 2)

    # tm is the lane dim of the accumulator/result -> 128-aligned; tn 128-aligned.
    tm = _largest_divisor_tile(Mpad, tile_m, 128)
    tn = _largest_divisor_tile(Npad, tile_n, 128)
    while 2 * tm * tn * 2 > h_budget and tn > 128:          # bf16 H, double-buffered
        tn = _largest_divisor_tile(Npad, tn // 2, 128)
    while 2 * tm * tn * 2 > h_budget and tm > 128:
        tm = _largest_divisor_tile(Mpad, tm // 2, 128)

    num_m, num_n = Mpad // tm, Npad // tn

    if x_resident:
        # Constant block index -> x DMA'd to VMEM once, sliced per step in-kernel.
        x_spec = pl.BlockSpec((B, Npad), lambda m, n: (0, 0))
    else:
        # Fallback for very long codes: tile x along N (re-fetched per M row).
        x_spec = pl.BlockSpec((B, tn), lambda m, n: (0, n))

    kernel = functools.partial(_syndrome_loss_kernel, tile_n=tn,
                               x_resident=x_resident)

    partials = pl.pallas_call(
        kernel,
        out_shape=jax.ShapeDtypeStruct((num_m, 1, 1), jnp.float32),
        grid_spec=pltpu.PrefetchScalarGridSpec(
            num_scalar_prefetch=0,
            grid=(num_m, num_n),                              # N (reduction) innermost
            in_specs=[
                x_spec,                                       # soft bits
                pl.BlockSpec((tm, tn), lambda m, n: (m, n)),  # H tile (bf16)
            ],
            # One partial parity sum per M tile -> M axis carries no state and
            # can be sharded across TensorCores (v7x megacore).
            out_specs=pl.BlockSpec((1, 1, 1), lambda m, n: (m, 0, 0)),
            scratch_shapes=[
                pltpu.VMEM((B, tm), jnp.float32),             # lane-dense accumulator
            ],
        ),
        compiler_params=pltpu.CompilerParams(
            dimension_semantics=("parallel", "arbitrary"),
            vmem_limit_bytes=vmem_budget_bytes + 8 * 1024 * 1024,
        ),
    )(x, h)

    inv_total = jnp.float32(1.0 / (M * B))
    return jnp.sum(partials[:, 0, 0]) * inv_total


def syndrome_loss_ref(soft_codeword, H_matrix=None):
    """Pure-JAX reference mirroring the PyTorch module."""
    if H_matrix is None:
        return jnp.array(0.0, dtype=jnp.float32)
    hard = (jax.nn.sigmoid(soft_codeword.astype(jnp.float32)) > 0.5).astype(jnp.float32)
    syn = jnp.mod(hard @ H_matrix.astype(jnp.float32).T, 2.0)
    return jnp.mean(jnp.abs(syn))


if __name__ == "__main__":
    key = jax.random.PRNGKey(0)
    k_x, k_h, k_x2, k_h2 = jax.random.split(key, 4)

    # Primary demo: divisible shapes, small tiles to exercise a real (2, 2)
    # grid with N-accumulation, resident-x slicing and per-M-tile partials.
    B, N, M = 8, 512, 256
    soft_codeword = jax.random.normal(k_x, (B, N), dtype=jnp.float32)
    H_matrix = jax.random.bernoulli(k_h, p=0.25, shape=(M, N)).astype(jnp.float32)

    loss = jax.block_until_ready(syndrome_loss(soft_codeword, H_matrix,
                                               tile_m=128, tile_n=256))
    ref = jax.block_until_ready(syndrome_loss_ref(soft_codeword, H_matrix))
    assert jnp.allclose(loss, ref, atol=1e-6), (loss, ref)

    # Non-divisible shapes: exercises the zero-padding path with default tiles.
    B2, N2, M2 = 5, 500, 250
    soft2 = jax.random.normal(k_x2, (B2, N2), dtype=jnp.float32)
    H2 = jax.random.bernoulli(k_h2, p=0.3, shape=(M2, N2)).astype(jnp.float32)
    loss2 = jax.block_until_ready(syndrome_loss(soft2, H2))
    ref2 = jax.block_until_ready(syndrome_loss_ref(soft2, H2))
    assert jnp.allclose(loss2, ref2, atol=1e-6), (loss2, ref2)

    # H_matrix=None path (matches torch.tensor(0.0) short-circuit).
    zero = jax.block_until_ready(syndrome_loss(soft_codeword, None))
    assert zero == 0.0

    print("KERNEL_OK")
</pallas_src>

<mosaic_0001>
module attributes {stable_mosaic.version = 11 : i64} {
  func.func @_syndrome_loss_kernel(%arg0: i32, %arg1: i32, %arg2: memref<8x512xf32, #tpu.memory_space<vmem>>, %arg3: memref<128x256xbf16, #tpu.memory_space<vmem>>, %arg4: memref<1x1x1xf32, #tpu.memory_space<vmem>>, %arg5: memref<8x128xf32, #tpu.memory_space<vmem>>) attributes {dimension_semantics = [#tpu.dimension_semantics<parallel>, #tpu.dimension_semantics<arbitrary>], iteration_bounds = array<i64: 2, 2>, scalar_prefetch = 0 : i64, scratch_operands = 1 : i64, tpu.core_type = #tpu.core_type<tc>, window_params = [{pipeline_mode = #tpu.pipeline_mode<synchronous>, transform_indices = @transform_0, window_bounds = array<i64: 8, 512>}, {transform_indices = @transform_1, window_bounds = array<i64: 128, 256>}, {transform_indices = @transform_2, window_bounds = array<i64: 1, 1, 1>}]} {
    %c0_i32 = arith.constant 0 : i32
    %0 = arith.cmpi eq, %arg1, %c0_i32 : i32
    %1 = arith.extui %0 : i1 to i32
    %c0_i32_0 = arith.constant 0 : i32
    %2 = arith.cmpi ne, %1, %c0_i32_0 : i32
    scf.if %2 {
      %cst_9 = arith.constant 0.000000e+00 : f32
      %20 = vector.broadcast %cst_9 : f32 to vector<8x128xf32>
      %c0_10 = arith.constant 0 : index
      %c0_11 = arith.constant 0 : index
      %21 = vector.load %arg5[%c0_10, %c0_11] : memref<8x128xf32, #tpu.memory_space<vmem>>, vector<8x128xf32>
      tpu.vector_store %arg5[%c0_10, %c0_11], %20 {strides = array<i32>} : memref<8x128xf32, #tpu.memory_space<vmem>>, vector<8x128xf32>,
    } else {
    }
    %c256_i32 = arith.constant 256 : i32
    %3 = arith.muli %arg1, %c256_i32 : i32
    %4 = tpu.assume_multiple %3, 128 : i32
    %c0 = arith.constant 0 : index
    %5 = arith.index_cast %4 : i32 to index
    %6 = vector.load %arg2[%c0, %5] : memref<8x512xf32, #tpu.memory_space<vmem>>, vector<8x256xf32>
    %cst = arith.constant 0.000000e+00 : f32
    %7 = vector.broadcast %cst : f32 to vector<8x256xf32>
    %8 = arith.cmpf ogt, %6, %7 : vector<8x256xf32>
    %9 = arith.extui %8 : vector<8x256xi1> to vector<8x256xi32>
    %10 = arith.sitofp %9 : vector<8x256xi32> to vector<8x256xf32>
    %11 = arith.truncf %10 : vector<8x256xf32> to vector<8x256xbf16>
    %c0_1 = arith.constant 0 : index
    %c0_2 = arith.constant 0 : index
    %12 = vector.load %arg5[%c0_1, %c0_2] : memref<8x128xf32, #tpu.memory_space<vmem>>, vector<8x128xf32>
    %c0_3 = arith.constant 0 : index
    %c0_4 = arith.constant 0 : index
    %13 = vector.load %arg3[%c0_3, %c0_4] : memref<128x256xbf16, #tpu.memory_space<vmem>>, vector<128x256xbf16>
    %cst_5 = arith.constant dense<0.000000e+00> : vector<8x128xf32>
    %14 = tpu.matmul %11, %13, %cst_5 {dimension_numbers = #tpu.dot_dimension_numbers<[1], [1], [0], [0], [0, 0, 1, 0], [], []>} : vector<8x256xbf16>, vector<128x256xbf16>, vector<8x128xf32> -> vector<8x128xf32>
    %15 = arith.addf %12, %14 : vector<8x128xf32>
    %c0_6 = arith.constant 0 : index
    %c0_7 = arith.constant 0 : index
    %16 = vector.load %arg5[%c0_6, %c0_7] : memref<8x128xf32, #tpu.memory_space<vmem>>, vector<8x128xf32>
    tpu.vector_store %arg5[%c0_6, %c0_7], %15 {strides = array<i32>} : memref<8x128xf32, #tpu.memory_space<vmem>>, vector<8x128xf32>,
    %c1_i32 = arith.constant 1 : i32
    %17 = arith.cmpi eq, %arg1, %c1_i32 : i32
    %18 = arith.extui %17 : i1 to i32
    %c0_i32_8 = arith.constant 0 : i32
    %19 = arith.cmpi ne, %18, %c0_i32_8 : i32
    scf.if %19 {
      %c0_9 = arith.constant 0 : index
      %c0_10 = arith.constant 0 : index
      %20 = vector.load %arg5[%c0_9, %c0_10] : memref<8x128xf32, #tpu.memory_space<vmem>>, vector<8x128xf32>
      %21 = arith.fptosi %20 : vector<8x128xf32> to vector<8x128xi32>
      %c1_i32_11 = arith.constant 1 : i32
      %22 = vector.broadcast %c1_i32_11 : i32 to vector<8x128xi32>
      %23 = arith.andi %21, %22 : vector<8x128xi32>
      %24 = arith.sitofp %23 : vector<8x128xi32> to vector<8x128xf32>
      %25 = vector.shape_cast %24 : vector<8x128xf32> to vector<1x8x128xf32>
      %cst_12 = arith.constant dense<0.000000e+00> : vector<1xf32>
      %26 = vector.multi_reduction <add>, %25, %cst_12 [1, 2] : vector<1x8x128xf32> to vector<1xf32>
      %27 = vector.shape_cast %26 : vector<1xf32> to vector<1x1x1xf32>
      %28 = vector.extract %27[0, 0, 0] : f32 from vector<1x1x1xf32>
      %29 = vector.broadcast %28 : f32 to vector<1x1x1xf32>
      %c0_13 = arith.constant 0 : index
      %c0_14 = arith.constant 0 : index
      %c0_15 = arith.constant 0 : index
      %30 = vector.load %arg4[%c0_13, %c0_14, %c0_15] : memref<1x1x1xf32, #tpu.memory_space<vmem>>, vector<1x1x1xf32>
      tpu.vector_store %arg4[%c0_13, %c0_14, %c0_15], %29 {strides = array<i32>} : memref<1x1x1xf32, #tpu.memory_space<vmem>>, vector<1x1x1xf32>,
    } else {
    }
    return
  }
  func.func @transform_0(%arg0: i32, %arg1: i32) -> (i32, i32) {
    %c0_i32 = arith.constant 0 : i32
    %c0_i32_0 = arith.constant 0 : i32
    %c0_i32_1 = arith.constant 0 : i32
    return %c0_i32, %c0_i32_0 : i32, i32
  }
  func.func @transform_1(%arg0: i32, %arg1: i32) -> (i32, i32) {
    %c0_i32 = arith.constant 0 : i32
    return %arg0, %arg1 : i32, i32
  }
  func.func @transform_2(%arg0: i32, %arg1: i32) -> (i32, i32, i32) {
    %c0_i32 = arith.constant 0 : i32
    %c0_i32_0 = arith.constant 0 : i32
    %c0_i32_1 = arith.constant 0 : i32
    return %arg0, %c0_i32, %c0_i32_0 : i32, i32, i32
  }
}

</mosaic_0001>

<bundles_post_ra>
// kernel: tpu_custom_call.1
= control target key start
LH: loop header
LB: loop body
LE: loop exit
PB: predicated region body
PF: predicated region fallthrough
CT: control target
= control target key end

     0   :  { %s988_s0 = inlined_call_operand.hbm [shape: f32[8,512], index: 0, kind: input, shape index: {}]   ;;  %s989_s1 = inlined_call_operand.hbm [shape: bf16[256,512], index: 1, kind: input, shape index: {}]   ;;  %s990_s2 = inlined_call_operand.vmem [shape: f32[2,1,1], index: 2, kind: output, shape index: {}]  }
   0x1   :  { %994 = sst [smem:[#allocation12_spill]] %s988_s0 }
   0x2   :  { %7 = vsyncpa [#allocation4], 0 }
   0x3   :  { %8 = vsyncpa [#allocation6], 0 }
   0x4   :  { %10 = vsyncpa [#allocation6 + $0x1], 0  ;;  %s801_s9 = smov 0   ;;  %s803_s10 = smov 0  }
   0x5   :  { %s805_s11 = smov 0   ;;  %s807_s12 = smov 0  }
   0x6   :  { %s809_s13 = smov 0   ;;  %s811_s14 = smov 0  }
   0x7   :  { %s813_s15 = smov 0   ;;  %s815_s16 = smov 0  }
   0x8 LB: > { %995 = sst [smem:[#allocation9_spill]] %s770_s14  ;;  %s448_s17 = sadd.s32 4294967295, %s778_s16   ;;  %s778_s16 = sphi %s815_s16, %s16_s16   ;;  %s774_s15 = sphi %s813_s15, %s1012_s15   ;;  %s770_s14 = sphi %s811_s14, %s1007_s14   ;;  %s766_s13 = sphi %s809_s13, %s1011_s13   ;;  %s762_s12 = sphi %s807_s12, %s1006_s12   ;;  %s758_s11 = sphi %s805_s11, %s1010_s11   ;;  %s754_s10 = sphi %s803_s10, %s1009_s10   ;;  %s750_s9 = sphi %s801_s9, %s1008_s9  }
   0x9   : > { %996 = sst [smem:[#allocation10_spill]] %s778_s16  ;;  %p65_p0 = scmp.ne.s32.totalorder %s758_s11, %s754_s10 }
   0xa   : > { %p66_p1 = scmp.eq.s32.totalorder %s778_s16, 0  ;;  %p71_p2 = scmp.ne.s32.totalorder %s754_s10, %s750_s9 }
   0xb   : > { %p845_p3 = scmp.eq.s32.totalorder %s448_s17, 0  ;;  %p450_p5 = scmp.ge.s32.totalorder %s778_s16, 1 }
   0xc   : > { %p849_p4 = por %p66_p1, %p65_p0  ;;  %p108_p7 = scmp.lt.s32.totalorder %s778_s16, 5 }
   0xd   : > { %p856_p6 = por %p845_p3, %p71_p2  ;;  %s1000_s0 = sld [smem:[#allocation12_spill]] }
   0xe   : > { %p864_p8 = pnand %p450_p5, %p108_p7  ;;  %s780_s26 = smov [#allocation3]  }
   0xf   : > { %s122_s27 = sshll.u32 %s780_s26, 4  ;;  %p576_p10 = scmp.lt.s32.totalorder %s778_s16, 4  ;;  %s123_s27 = int_to_ptr.vmem [resolvable:$true] %s122_s27 }
  0x10   : > { %p567_p9 = pneg %p864_p8  ;;  %s25_s29 = sadd.s32 1, %s770_s14 }
  0x11   : > { %p875_p12 = pnand %p576_p10, %p849_p4  ;;  %s28_s30 = sadd.s32 1, %s774_s15 }
  0x12   : > { %p568_p11 = pnand %p567_p9, %p845_p3  ;;  %p26_p13 = scmp.ge.s32.totalorder %s25_s29, 2 }
  0x13   : > { %s120_s24 = sshll.u32 %s1000_s0, 4  ;;  %s133_s3 = sand.u32 1, %s758_s11   ;;  %s121_s24 = int_to_ptr.hbm [resolvable:$true] %s120_s24 }
  0x14   : > { %570 = dma.hbm_to_vmem [thread:$0]  (!%p568_p11), %s121_s24, 512, %s123_s27, [#allocation4]  }
  0x15   : > { %s453_s4 = sshll.u32 %s133_s3, 7  ;;  %s1014_s29 = smov (%p26_p13, %s25_s29), 0 }
  0x16   : > { %1003 = sst [smem:[#allocation11_spill]] %s1014_s29  ;;  %s1016_s30 = smov (!%p26_p13, %s28_s30), %s774_s15 }
  0x17   : > { %s54_s5 = ssub.s32 %s770_s14, %s1014_s29  ;;  %p30_p0 = scmp.ge.s32.totalorder %s1016_s30, 2 }
  0x18   : > { %s455_s6 = sshll.u32 %s770_s14, 1  ;;  %s537_s7 = sshll.u32 %s774_s15, 6 }
  0x19   : > { %s137_s8 = scalar_lea.vmem [#allocation5], %s453_s4  ;;  %s1018_s30 = smov (%p30_p0, %s1016_s30), 0 }
  0x1a   : > { %s148_s9 = sshll.u32 %s137_s8, 4  ;;  %s143_s17 = sadd.s32 %s537_s7, %s455_s6  ;;  %s149_s9 = int_to_ptr.vmem [resolvable:$true] %s148_s9 }
  0x1b   : > { %s53_s20 = ssub.s32 %s774_s15, %s1018_s30  ;;  %s457_s22 = sshll.u32 %s143_s17, 2 }
  0x1c   : > { %s55_s23 = sor.u32 %s54_s5, %s53_s20  ;;  %s145_s27 = scalar_lea.hbm %s989_s1, %s457_s22 }
  0x1d   : > { %p56_p1 = scmp.eq.s32.totalorder %s55_s23, 0  ;;  %s146_s18 = sshll.u32 %s145_s27, 4  ;;  %s147_s18 = int_to_ptr.hbm [resolvable:$true] %s146_s18 }
  0x1e   : > { %s1004_s0 = sadd.s32 1, %s758_s11  ;;  %s134_s4 = scalar_lea.sflag [#allocation6], %s133_s3 }
  0x1f   : > { %s899_s29 = scalar_select %p56_p1, %s758_s11, %s1004_s0  }
  0x20   : > { %s781_s8 = smov 256   ;;  %s782_s14 = smov 128  }
  0x21   : > { %s783_s16 = smov 8   ;;  %160 = sbr.rel (%p864_p8) target bundleno = 446 (0x1be), region = 28 }
  0x22   : > { %574 = dma.hbm_to_vmem [thread:$0]  (!%p875_p12), %s147_s18, 2048, %s149_s9, %s134_s4, %s781_s8, %s782_s14, %s783_s16  }
  0x26   : > { %741 = dma.done.wait (%p845_p3), [#allocation4], 512  }
  0x27   : > { %743 = vsyncadd (%p845_p3), [#allocation4], 4294966784  ;;  %s167_s5 = sand.u32 1, %s754_s10  }
  0x28   : > { %s460_s0 = sshll.u32 %s167_s5, 7  ;;  %s168_s6 = scalar_lea.sflag [#allocation6], %s167_s5 }
  0x29   : > { %s910_s3 = scalar_lea.vmem [#allocation5], %s460_s0 }
  0x2a   : > { %745 = dma.done.wait (%p856_p6), %s168_s6, 2048  }
  0x2b   : > { %747 = vsyncadd (%p856_p6), %s168_s6, 4294965248  ;;  %p193_p2 = scmp.lt.s32.totalorder %s766_s13, 1  ;;  %p461_p3 = scmp.ne.s32.totalorder %s762_s12, 0 }
  0x2d   : > { %s1020_s13 = smov (!%p193_p2, %s766_s13), 1  ;;  %199 = sbr.rel (%p461_p3) target bundleno = 52 (0x34), region = 40 }
  0x2e   : > { %s195_s18 = scalar_lea.vmem %s990_s2, %s1020_s13 }
  0x32   : > { %v784_v0 = vmov 0.0  }
  0x33   : > { %200 = vst [vmem:[#allocation2] sm:$0xff] %v784_v0 }
  0x34 PF: > { %v524_v1 = vld [vmem:[%s910_s3 + $0x70] sm:$0xf]  ;;  %v553_v2 = vld [vmem:[%s910_s3 + $0x74] sm:$0xf0]  ;;  %v552_v3 = vld [vmem:[%s910_s3 + $0x74] sm:$0xf] }
  0x35   : > { %v525_v4 = vor.u32 %v553_v2, %v524_v1  ;;  %v526_v5 = vld [vmem:[%s910_s3 + $0x78] sm:$0xf0]  ;;  %v516_v7 = vld [vmem:[%s910_s3 + $0x60] sm:$0xf]  ;;  %v551_v8 = vld [vmem:[%s910_s3 + $0x64] sm:$0xf0] }
  0x36   : > { %v529_v6 = vor.u32 %v552_v3, %v526_v5  ;;  %v550_v9 = vld [vmem:[%s910_s3 + $0x64] sm:$0xf]  ;;  %v518_v10 = vld [vmem:[%s910_s3 + $0x68] sm:$0xf0]  ;;  %v517_v11 = vor.u32 %v551_v8, %v516_v7  ;;  %v508_v13 = vld [vmem:[%s910_s3 + $0x50] sm:$0xf] }
  0x37   : > { %313 = vmatpush.bf16.xpose.msra.mxu0 %v525_v4  ;;  %v521_v12 = vor.u32 %v550_v9, %v518_v10  ;;  %v549_v14 = vld [vmem:[%s910_s3 + $0x54] sm:$0xf0]  ;;  %v548_v15 = vld [vmem:[%s910_s3 + $0x54] sm:$0xf]  ;;  %v510_v16 = vld [vmem:[%s910_s3 + $0x58] sm:$0xf0] }
  0x38   : > { %326 = vmatpush.bf16.xpose.msra.mxu1 %v529_v6  ;;  %v509_v17 = vor.u32 %v549_v14, %v508_v13  ;;  %v513_v18 = vor.u32 %v548_v15, %v510_v16  ;;  %v500_v19 = vld [vmem:[%s910_s3 + $0x40] sm:$0xf]  ;;  %v547_v20 = vld [vmem:[%s910_s3 + $0x44] sm:$0xf0]  ;;  %v546_v21 = vld [vmem:[%s910_s3 + $0x44] sm:$0xf] }
  0x39   : > { %v502_v22 = vld [vmem:[%s910_s3 + $0x48] sm:$0xf0]  ;;  %v501_v23 = vor.u32 %v547_v20, %v500_v19  ;;  %v492_v25 = vld [vmem:[%s910_s3 + $0x30] sm:$0xf]  ;;  %v545_v26 = vld [vmem:[%s910_s3 + $0x34] sm:$0xf0] }
  0x3a   : > { %v505_v24 = vor.u32 %v546_v21, %v502_v22  ;;  %v544_v27 = vld [vmem:[%s910_s3 + $0x34] sm:$0xf]  ;;  %v494_v28 = vld [vmem:[%s910_s3 + $0x38] sm:$0xf0]  ;;  %v493_v29 = vor.u32 %v545_v26, %v492_v25  ;;  %v484_v31 = vld [vmem:[%s910_s3 + $0x20] sm:$0xf] }
  0x3b   : > { %v497_v30 = vor.u32 %v544_v27, %v494_v28  ;;  %v543_v32 = vld [vmem:[%s910_s3 + $0x24] sm:$0xf0]  ;;  %v542_v33 = vld [vmem:[%s910_s3 + $0x24] sm:$0xf]  ;;  %v486_v34 = vld [vmem:[%s910_s3 + $0x28] sm:$0xf0] }
  0x3c   : > { %v485_v35 = vor.u32 %v543_v32, %v484_v31  ;;  %v489_v36 = vor.u32 %v542_v33, %v486_v34  ;;  %v476_v37 = vld [vmem:[%s910_s3 + $0x10] sm:$0xf]  ;;  %v541_v38 = vld [vmem:[%s910_s3 + $0x14] sm:$0xf0]  ;;  %v540_v39 = vld [vmem:[%s910_s3 + $0x14] sm:$0xf] }
  0x3d   : > { %v478_v40 = vld [vmem:[%s910_s3 + $0x18] sm:$0xf0]  ;;  %s462_s19 = sshll.u32 %s762_s12, 8  ;;  %v477_v41 = vor.u32 %v541_v38, %v476_v37  ;;  %v468_v43 = vld [vmem:[%s910_s3] sm:$0xf]  ;;  %p534_p4 = scmp.ne.s32.totalorder %s762_s12, 1 }
  0x3e   : > { %v481_v42 = vor.u32 %v540_v39, %v478_v40  ;;  %s202_s21 = sshra.s32 %s462_s19, 7  ;;  %v539_v44 = vld [vmem:[%s910_s3 + $0x4] sm:$0xf0]  ;;  %v538_v45 = vld [vmem:[%s910_s3 + $0x4] sm:$0xf]  ;;  %v216_v53 = vld [vmem:[#allocation2] sm:$0xff] }
  0x3f   : > { %314 = vmatpush.bf16.xpose.msra.mxu0 %v517_v11  ;;  %s463_s25 = sshll.u32 %s202_s21, 3  ;;  %v470_v46 = vld [vmem:[%s910_s3 + $0x8] sm:$0xf0]  ;;  %v469_v47 = vor.u32 %v539_v44, %v468_v43  ;;  %v785_v51 = vmov 1.0|1.0  }
  0x40   : > { %327 = vmatpush.bf16.xpose.msra.mxu1 %v521_v12  ;;  %v473_v48 = vor.u32 %v538_v45, %v470_v46  ;;  %s205_s28 = scalar_lea.vmem [#allocation3], %s463_s25 }
  0x41   : > { %v206_v49 = vld [vmem:[%s205_s28] sm:$0xff]  ;;  %v207_v50 = vld [vmem:[%s205_s28 + $0x8] sm:$0xff] }
  0x42   : > { %vm208_vm0 = vcmp.gt.f32.partialorder %v206_v49, 0.0  ;;  %vm209_vm1 = vcmp.gt.f32.partialorder %v207_v50, 0.0 }
  0x43   : > { %vm530_vm2 = vmpackc.low %vm208_vm0, %vm208_vm0 }
  0x44   : > { %vm532_vm3 = vmpackc.low %vm209_vm1, %vm209_vm1 }
  0x47   : > { %315 = vmatpush.bf16.xpose.msra.mxu0 %v509_v17 }
  0x48   : > { %328 = vmatpush.bf16.xpose.msra.mxu1 %v513_v18 }
  0x4f   : > { %316 = vmatpush.bf16.xpose.msra.mxu0 %v501_v23 }
  0x50   : > { %329 = vmatpush.bf16.xpose.msra.mxu1 %v505_v24 }
  0x57   : > { %317 = vmatpush.bf16.xpose.msra.mxu0 %v493_v29 }
  0x58   : > { %330 = vmatpush.bf16.xpose.msra.mxu1 %v497_v30 }
  0x5f   : > { %318 = vmatpush.bf16.xpose.msra.mxu0 %v485_v35 }
  0x60   : > { %331 = vmatpush.bf16.xpose.msra.mxu1 %v489_v36 }
  0x67   : > { %319 = vmatpush.bf16.xpose.msra.mxu0 %v477_v41 }
  0x68   : > { %332 = vmatpush.bf16.xpose.msra.mxu1 %v481_v42 }
  0x6f   : > { %320 = vmatpush.bf16.xpose.msra.mxu0 %v469_v47 }
  0x70   : > { %333 = vmatpush.bf16.xpose.msra.mxu1 %v473_v48 }
  0x76   : > { %531 = vmatmul.msk.bf16.vlgmr.msra.gmra.mxu0 %vm530_vm2, %v785_v51 }
  0x77   : > { %533 = vmatmul.msk.bf16.vlgmr.msra.gmra.mxu1 %vm532_vm3, %v785_v51 }
  0xf3   : > { %v322_v52 = vpop.f32.mrf.mxu0 }
  0xf4   : > { %v335_v54 = vpop.f32.mrf.mxu1 }
  0xf5   : > { %v336_v55 = vadd.f32 %v335_v54, %v322_v52 }
  0xf7   : > { %v339_v56 = vadd.f32 %v336_v55, %v216_v53 }
  0xf8   : > { %344 = sbr.rel (%p534_p4) target bundleno = 446 (0x1be), region = 44 }
  0xf9   : > { %340 = vst [vmem:[#allocation2] sm:$0xff] %v339_v56 }
  0xfb   : > { %v324_v57 = vpop.f32.mrf.mxu0 }
  0xfc   : > { %v337_v58 = vpop.f32.mrf.mxu1 }
  0xfd   : > { %vm359_vm5 = vcmask 0  }
 0x100   : > { %v345_v59 = vld [vmem:[#allocation2] sm:$0xff] }
 0x101   : > { %vm554_vm4 = vcmp.lt.s32.totalorder %v345_v59, 0  ;;  %v555_v60 = vceil.f32 %v345_v59  ;;  %v556_v61 = vfloor.f32 %v345_v59 }
 0x103   : > { %v557_v62 = vsel %vm554_vm4, %v555_v60, %v556_v61 }
 0x104   : > { %v558_v63 = vcvt.f32.s32 %v557_v62 }
 0x106   : > { %v347_v0 = vand.u32 1, %v558_v63 }
 0x108   : > { %v348_v1 = vcvt.s32.f32 %v347_v0 }
 0x10a   : > { %349 = vadd.xlane.f32.xlu0 %v348_v1 }
 0x17d   : > { %v350_v2 = vpop.xlane.xlu0 %349 }
 0x17e   : > { %v351_v3 = vrot.slane %v350_v2, 4 }
 0x180   : > { %v352_v4 = vadd.f32 %v351_v3, %v350_v2 }
 0x182   : > { %v353_v5 = vrot.slane %v352_v4, 2 }
 0x184   : > { %v354_v6 = vadd.f32 %v353_v5, %v352_v4 }
 0x186   : > { %v355_v7 = vrot.slane %v354_v6, 1 }
 0x188   : > { %v356_v8 = vadd.f32 %v355_v7, %v354_v6 }
 0x18a   : > { %559 = vpush %v356_v8 }
 0x1bb   : > { %s560_s12 = spop %559 }
 0x1bc   : > { %v358_v9 = vstv %s560_s12 }
 0x1bd   : > { %360 = vst.msk [vmem:[%s195_s18] sm:$0x1] %vm359_vm5, %v358_v9 }
 0x1be PF: > { %s1005_s17 = sld [smem:[#allocation10_spill]]  ;;  %s1008_s9 = smov %s754_s10 }
 0x1bf   : > { %s1006_s12 = sld [smem:[#allocation9_spill]]  ;;  %s1009_s10 = smov %s758_s11 }
 0x1c0   : > { %s1007_s14 = sld [smem:[#allocation11_spill]]  ;;  %s1010_s11 = smov %s899_s29 }
 0x1c1   : > { %s1011_s13 = smov %s774_s15  ;;  %s1012_s15 = smov %s1018_s30 }
 0x1c4   : > { %s16_s16 = sadd.s32 1, %s1005_s17  }
 0x1c5   : > { %p13_p5 = scmp.ge.s32.totalorder %s16_s16, 6  }
 0x1c7   :  { %15 = sbr.rel (!%p13_p5) target bundleno = 8 (0x8), region = 82 }
 0x1cc   :  { %378 = vsyncpa [#allocation4], 1 }
 0x1cd   :  { %380 = vsyncpa [#allocation4 + $0x1], 1 }
 0x1ce   :  { %381 = vsyncpa [#allocation6], 1 }
 0x1cf   :  { %383 = vsyncpa [#allocation6 + $0x1], 1 }

</bundles_post_ra>
